<compile_context>
chip_gen: v6e
topology: v6e:2x2x1
jax: 0.10.0
libtpu: 0.0.40
codegen_flags: <defaults>
</compile_context>

<pallas_src>
import functools

import jax
import jax.numpy as jnp
from jax.experimental import pallas as pl
from jax.experimental.pallas import tpu as pltpu


_TARGET_BLOCK_BYTES = 2 << 20   # ~2 MiB per input block (v5e/v6e/v7x friendly)
_MAX_BATCH_FOLD = 32            # bounds the static unroll of the per-batch loop


def _matchshifted_kernel(left_ref, right_ref, out_ref, *, shift, width):
    # left_ref / right_ref: (bt, ct, T); out_ref: (bt, 2, ct, T); T = rows * width.
    bt, ct, T = left_ref.shape

    if shift == 0:
        for b in range(bt):
            out_ref[b, 0] = left_ref[b]
            out_ref[b, 1] = right_ref[b]
        return

    # Column index within each image row: built once at (1, T), broadcast once to
    # (ct, T), reused for both halves of every folded batch (VPU select only).
    lane = jax.lax.broadcasted_iota(jnp.int32, (1, T), 1)
    if (width & (width - 1)) == 0:          # power-of-two width: cheaper than %
        col = lane & (width - 1)
    else:
        col = lane % width
    keep = jnp.broadcast_to(col >= shift, (ct, T))

    # bt is a small static int (tile picker caps it), so this unrolls; each
    # iteration is load -> select/roll -> store with no live state carried.
    for b in range(bt):
        # Left half: zero out columns < shift — no lane movement needed.
        out_ref[b, 0] = jnp.where(keep, left_ref[b], 0)
        # Right half: rotate right by `shift` along the flattened lane axis (XLU),
        # then mask (VPU). T is a multiple of `width`, so any wrap-around across a
        # row boundary only lands in positions the mask zeroes out.
        rolled = pltpu.roll(right_ref[b], shift, axis=1)
        out_ref[b, 1] = jnp.where(keep, rolled, 0)


def _pick_tiles(B, C, H, W, itemsize,
                target_bytes=_TARGET_BLOCK_BYTES, max_bt=_MAX_BATCH_FOLD):
    """Pick (batch_tile, channel_tile, rows_per_tile) for the input blocks.

    Invariants (needed for BlockSpec legality and the in-kernel roll):
      * rows divides H and rows*W is a multiple of 128 lanes (or the full H*W),
        so tiles are lane-dense and tile boundaries align to image-row
        boundaries (roll wrap-around only hits masked-to-zero columns).
      * ct divides C and is a multiple of 8 (or equals C)  -> (8,128) rule.
      * bt divides B.
    Preference: the largest block <= target_bytes; whole batches are folded in
    when one batch's (C, H*W) slab is small (amortizes the ~0.35 us fixed
    per-grid-step cost). If even one row-tile block exceeds the budget the
    channel axis is split too (guards VMEM for huge C*H*W with unaligned W).
    """
    row_cands = [r for r in range(1, H + 1)
                 if H % r == 0 and ((r * W) % 128 == 0 or r * W == H * W)]

    fitting_rows = [r for r in row_cands if C * r * W * itemsize <= target_bytes]
    if fitting_rows:
        rows, ct = max(fitting_rows), C
    else:
        rows = min(row_cands)
        ct_cands = [c for c in range(1, C + 1)
                    if C % c == 0 and (c % 8 == 0 or c == C)]
        ct_fit = [c for c in ct_cands if c * rows * W * itemsize <= target_bytes]
        ct = max(ct_fit) if ct_fit else min(ct_cands)

    bt = 1
    if ct == C and rows == H:
        bt_cands = [b for b in range(1, min(B, max_bt) + 1) if B % b == 0]
        bt_fit = [b for b in bt_cands if b * C * H * W * itemsize <= target_bytes]
        if bt_fit:
            bt = max(bt_fit)

    # v7x has 2 TensorCores sharing HBM: keep >= 2 grid steps when each half is
    # still a decent-sized block; for tiny problems one step is cheaper.
    total_steps = (B // bt) * (C // ct) * (H // rows)
    block_bytes = bt * ct * rows * W * itemsize
    if total_steps == 1 and bt > 1 and block_bytes >= (256 << 10):
        bt = max(d for d in range(1, bt) if bt % d == 0)   # largest proper divisor

    return bt, ct, rows


def matchshifted(left, right, shift):
    """left, right: (B, C, H, W); shift: Python int. Returns (B, 2C, 1, H, W)."""
    assert left.shape == right.shape and left.dtype == right.dtype
    B, C, H, W = left.shape
    shift = int(shift)
    assert 0 <= shift <= W

    HW = H * W
    left_f = left.reshape(B, C, HW)     # contiguous: free reshape
    right_f = right.reshape(B, C, HW)

    itemsize = jnp.dtype(left.dtype).itemsize
    bt, ct, rows = _pick_tiles(B, C, H, W, itemsize)
    T = rows * W
    grid = (B // bt, C // ct, H // rows)
    total_steps = grid[0] * grid[1] * grid[2]
    in_block_bytes = bt * ct * T * itemsize

    in_idx = lambda b, c, t: (b, c, t)
    if in_block_bytes < (256 << 10) and total_steps > 2:
        # Degenerate shapes that cannot reach the block-size sweet spot: hide
        # per-step DMA issue latency with deeper input buffering instead.
        in_spec = pl.BlockSpec((bt, ct, T), in_idx, pipeline_mode=pl.Buffered(3))
        n_in_buf = 3
    else:
        in_spec = pl.BlockSpec((bt, ct, T), in_idx)
        n_in_buf = 2
    out_spec = pl.BlockSpec((bt, 2, ct, T), lambda b, c, t: (b, 0, c, t))

    # VMEM budget: 2 inputs x n_buf + double-buffered output (2x an input block),
    # plus headroom. Set explicitly so ~2 MiB blocks also clear v5e's 16 MiB
    # scoped default while staying well under v7x's 64 MiB physical VMEM.
    working_set = (2 * n_in_buf + 4) * in_block_bytes
    vmem_limit = int(min(48 << 20, max(16 << 20, working_set * 3 // 2)))

    out = pl.pallas_call(
        functools.partial(_matchshifted_kernel, shift=shift, width=W),
        out_shape=jax.ShapeDtypeStruct((B, 2, C, HW), left.dtype),
        grid_spec=pl.GridSpec(
            grid=grid,
            in_specs=[in_spec, in_spec],
            out_specs=out_spec,
        ),
        compiler_params=pltpu.CompilerParams(
            dimension_semantics=("parallel", "parallel", "parallel"),
            vmem_limit_bytes=vmem_limit,
        ),
    )(left_f, right_f)

    # (B, 2, C, H*W) -> (B, 2C, 1, H, W): same memory order as
    # torch.cat((shifted_left, shifted_right), 1).view(B, 2C, 1, H, W).
    return out.reshape(B, 2 * C, 1, H, W)


def _reference(left, right, shift):
    B, C, H, W = left.shape
    col = jnp.arange(W)
    mask = (col >= shift)[None, None, None, :]
    sl = jnp.where(mask, left, 0)
    sr = jnp.where(mask, jnp.roll(right, shift, axis=3), 0)
    return jnp.concatenate([sl, sr], axis=1).reshape(B, 2 * C, 1, H, W)


if __name__ == "__main__":
    key = jax.random.PRNGKey(0)
    k1, k2 = jax.random.split(key)
    B, C, H, W = 2, 4, 16, 16

    left = jax.random.normal(k1, (B, C, H, W), dtype=jnp.float32)
    right = jax.random.normal(k2, (B, C, H, W), dtype=jnp.float32)

    shift = 3
    out = jax.block_until_ready(matchshifted(left, right, shift))
    ref = _reference(left, right, shift)
    assert out.shape == (B, 2 * C, 1, H, W), out.shape
    assert jnp.allclose(out, ref, atol=1e-6), "mismatch vs reference (shift=3)"

    # Edge cases: shift == 0 and shift == W.
    for s in (0, W):
        o = jax.block_until_ready(matchshifted(left, right, s))
        r = _reference(left, right, s)
        assert jnp.allclose(o, r, atol=1e-6), f"mismatch vs reference (shift={s})"

    print("KERNEL_OK")
</pallas_src>

<mosaic_0001>
module attributes {stable_mosaic.version = 11 : i64} {
  func.func @_matchshifted_kernel(%arg0: i32, %arg1: i32, %arg2: i32, %arg3: memref<2x4x256xf32, #tpu.memory_space<vmem>>, %arg4: memref<2x4x256xf32, #tpu.memory_space<vmem>>, %arg5: memref<2x2x4x256xf32, #tpu.memory_space<vmem>>) attributes {dimension_semantics = [#tpu.dimension_semantics<parallel>, #tpu.dimension_semantics<parallel>, #tpu.dimension_semantics<parallel>], iteration_bounds = array<i64: 1, 1, 1>, scalar_prefetch = 0 : i64, scratch_operands = 0 : i64, tpu.core_type = #tpu.core_type<tc>, window_params = [{transform_indices = @transform_0, window_bounds = array<i64: 2, 4, 256>}, {transform_indices = @transform_1, window_bounds = array<i64: 2, 4, 256>}, {transform_indices = @transform_2, window_bounds = array<i64: 2, 2, 4, 256>}]} {
    %0 = tpu.iota {dimensions = array<i32: 1>} : vector<1x256xi32>
    %c15_i32 = arith.constant 15 : i32
    %1 = vector.broadcast %c15_i32 : i32 to vector<1x256xi32>
    %2 = arith.andi %0, %1 : vector<1x256xi32>
    %c3_i32 = arith.constant 3 : i32
    %3 = vector.broadcast %c3_i32 : i32 to vector<1x256xi32>
    %4 = arith.cmpi sge, %2, %3 : vector<1x256xi32>
    %5 = vector.shape_cast %4 : vector<1x256xi1> to vector<1x256xi1>
    %6 = vector.broadcast %5 : vector<1x256xi1> to vector<4x256xi1>
    %c0 = arith.constant 0 : index
    %c0_0 = arith.constant 0 : index
    %c0_1 = arith.constant 0 : index
    %7 = vector.load %arg3[%c0, %c0_0, %c0_1] : memref<2x4x256xf32, #tpu.memory_space<vmem>>, vector<1x4x256xf32>
    %8 = vector.shape_cast %7 : vector<1x4x256xf32> to vector<4x256xf32>
    %c0_i32 = arith.constant 0 : i32
    %9 = arith.sitofp %c0_i32 : i32 to f32
    %10 = vector.broadcast %9 : f32 to vector<4x256xf32>
    %11 = arith.select %6, %8, %10 : vector<4x256xi1>, vector<4x256xf32>
    %c0_2 = arith.constant 0 : index
    %c0_3 = arith.constant 0 : index
    %c0_4 = arith.constant 0 : index
    %c0_5 = arith.constant 0 : index
    %12 = vector.load %arg5[%c0_2, %c0_3, %c0_4, %c0_5] : memref<2x2x4x256xf32, #tpu.memory_space<vmem>>, vector<1x1x4x256xf32>
    %13 = vector.shape_cast %12 : vector<1x1x4x256xf32> to vector<4x256xf32>
    %14 = vector.shape_cast %11 : vector<4x256xf32> to vector<1x1x4x256xf32>
    tpu.vector_store %arg5[%c0_2, %c0_3, %c0_4, %c0_5], %14 {strides = array<i32>} : memref<2x2x4x256xf32, #tpu.memory_space<vmem>>, vector<1x1x4x256xf32>,
    %c0_6 = arith.constant 0 : index
    %c0_7 = arith.constant 0 : index
    %c0_8 = arith.constant 0 : index
    %15 = vector.load %arg4[%c0_6, %c0_7, %c0_8] : memref<2x4x256xf32, #tpu.memory_space<vmem>>, vector<1x4x256xf32>
    %16 = vector.shape_cast %15 : vector<1x4x256xf32> to vector<4x256xf32>
    %c3_i32_9 = arith.constant 3 : i32
    %17 = tpu.dynamic_rotate %16 by %c3_i32_9 dim 1 : vector<4x256xf32>, i32 -> vector<4x256xf32>
    %c0_i32_10 = arith.constant 0 : i32
    %18 = arith.sitofp %c0_i32_10 : i32 to f32
    %19 = vector.broadcast %18 : f32 to vector<4x256xf32>
    %20 = arith.select %6, %17, %19 : vector<4x256xi1>, vector<4x256xf32>
    %c0_11 = arith.constant 0 : index
    %c1 = arith.constant 1 : index
    %c0_12 = arith.constant 0 : index
    %c0_13 = arith.constant 0 : index
    %21 = vector.load %arg5[%c0_11, %c1, %c0_12, %c0_13] : memref<2x2x4x256xf32, #tpu.memory_space<vmem>>, vector<1x1x4x256xf32>
    %22 = vector.shape_cast %21 : vector<1x1x4x256xf32> to vector<4x256xf32>
    %23 = vector.shape_cast %20 : vector<4x256xf32> to vector<1x1x4x256xf32>
    tpu.vector_store %arg5[%c0_11, %c1, %c0_12, %c0_13], %23 {strides = array<i32>} : memref<2x2x4x256xf32, #tpu.memory_space<vmem>>, vector<1x1x4x256xf32>,
    %c1_14 = arith.constant 1 : index
    %c0_15 = arith.constant 0 : index
    %c0_16 = arith.constant 0 : index
    %24 = vector.load %arg3[%c1_14, %c0_15, %c0_16] : memref<2x4x256xf32, #tpu.memory_space<vmem>>, vector<1x4x256xf32>
    %25 = vector.shape_cast %24 : vector<1x4x256xf32> to vector<4x256xf32>
    %c0_i32_17 = arith.constant 0 : i32
    %26 = arith.sitofp %c0_i32_17 : i32 to f32
    %27 = vector.broadcast %26 : f32 to vector<4x256xf32>
    %28 = arith.select %6, %25, %27 : vector<4x256xi1>, vector<4x256xf32>
    %c1_18 = arith.constant 1 : index
    %c0_19 = arith.constant 0 : index
    %c0_20 = arith.constant 0 : index
    %c0_21 = arith.constant 0 : index
    %29 = vector.load %arg5[%c1_18, %c0_19, %c0_20, %c0_21] : memref<2x2x4x256xf32, #tpu.memory_space<vmem>>, vector<1x1x4x256xf32>
    %30 = vector.shape_cast %29 : vector<1x1x4x256xf32> to vector<4x256xf32>
    %31 = vector.shape_cast %28 : vector<4x256xf32> to vector<1x1x4x256xf32>
    tpu.vector_store %arg5[%c1_18, %c0_19, %c0_20, %c0_21], %31 {strides = array<i32>} : memref<2x2x4x256xf32, #tpu.memory_space<vmem>>, vector<1x1x4x256xf32>,
    %c1_22 = arith.constant 1 : index
    %c0_23 = arith.constant 0 : index
    %c0_24 = arith.constant 0 : index
    %32 = vector.load %arg4[%c1_22, %c0_23, %c0_24] : memref<2x4x256xf32, #tpu.memory_space<vmem>>, vector<1x4x256xf32>
    %33 = vector.shape_cast %32 : vector<1x4x256xf32> to vector<4x256xf32>
    %c3_i32_25 = arith.constant 3 : i32
    %34 = tpu.dynamic_rotate %33 by %c3_i32_25 dim 1 : vector<4x256xf32>, i32 -> vector<4x256xf32>
    %c0_i32_26 = arith.constant 0 : i32
    %35 = arith.sitofp %c0_i32_26 : i32 to f32
    %36 = vector.broadcast %35 : f32 to vector<4x256xf32>
    %37 = arith.select %6, %34, %36 : vector<4x256xi1>, vector<4x256xf32>
    %c1_27 = arith.constant 1 : index
    %c1_28 = arith.constant 1 : index
    %c0_29 = arith.constant 0 : index
    %c0_30 = arith.constant 0 : index
    %38 = vector.load %arg5[%c1_27, %c1_28, %c0_29, %c0_30] : memref<2x2x4x256xf32, #tpu.memory_space<vmem>>, vector<1x1x4x256xf32>
    %39 = vector.shape_cast %38 : vector<1x1x4x256xf32> to vector<4x256xf32>
    %40 = vector.shape_cast %37 : vector<4x256xf32> to vector<1x1x4x256xf32>
    tpu.vector_store %arg5[%c1_27, %c1_28, %c0_29, %c0_30], %40 {strides = array<i32>} : memref<2x2x4x256xf32, #tpu.memory_space<vmem>>, vector<1x1x4x256xf32>,
    return
  }
  func.func @transform_0(%arg0: i32, %arg1: i32, %arg2: i32) -> (i32, i32, i32) {
    %c0_i32 = arith.constant 0 : i32
    return %arg0, %arg1, %arg2 : i32, i32, i32
  }
  func.func @transform_1(%arg0: i32, %arg1: i32, %arg2: i32) -> (i32, i32, i32) {
    %c0_i32 = arith.constant 0 : i32
    return %arg0, %arg1, %arg2 : i32, i32, i32
  }
  func.func @transform_2(%arg0: i32, %arg1: i32, %arg2: i32) -> (i32, i32, i32, i32) {
    %c0_i32 = arith.constant 0 : i32
    %c0_i32_0 = arith.constant 0 : i32
    return %arg0, %c0_i32, %arg1, %arg2 : i32, i32, i32, i32
  }
}

</mosaic_0001>

<bundles_post_ra>
// kernel: tpu_custom_call.1
= control target key start
LH: loop header
LB: loop body
LE: loop exit
PB: predicated region body
PF: predicated region fallthrough
CT: control target
= control target key end

     0   :  { %7 = vsyncpa [#allocation3], 0  ;;  %s270_s0 = inlined_call_operand.hbm [shape: f32[2,4,256], index: 0, kind: input, shape index: {}]   ;;  %s271_s1 = inlined_call_operand.hbm [shape: f32[2,4,256], index: 1, kind: input, shape index: {}]   ;;  %s272_s2 = inlined_call_operand.hbm [shape: f32[2,2,4,256], index: 2, kind: output, shape index: {}]  }
   0x1   :  { %8 = vsyncpa [#allocation6], 0 }
   0x2   :  { %9 = vsyncpa [#allocation4], 0  ;;  %s207_s9 = smov [#allocation2]  }
   0x3   :  { %s15_s10 = sshll.u32 %s207_s9, 4  ;;  %s16_s10 = int_to_ptr.vmem [resolvable:$true] %s15_s10 }
   0x4   :  { %s149_s11 = scalar_lea.vmem %s16_s10, 256  ;;  %p154_p1 = scmp.lt.s32.totalorder %s16_s10, %s16_s10 }
   0x5   :  { %p150_p0 = scmp.ne.s32.totalorder %s16_s10, %s149_s11  ;;  %p155_p2 = scmp.lt.s32.totalorder %s149_s11, %s149_s11 }
   0x7   :  { %p156_p3 = por %p155_p2, %p154_p1 }
   0x9   :  { %p157_p4 = pnand %p156_p3, %p150_p0 }
   0xb   :  { %160 = shalt.err (!%p157_p4)
}
   0xc   :  { %s208_s12 = smov 128   ;;  %s209_s13 = smov 8  }
   0xd   :  { %21 = dma.hbm_to_vmem [thread:$0]  %s270_s0, 256, %s16_s10, [#allocation3], %s208_s12, %s208_s12, %s209_s13  }
   0xe   :  { %s210_s16 = smov [#allocation5]  }
   0xf   :  { %s27_s17 = sshll.u32 %s210_s16, 4  ;;  %s28_s17 = int_to_ptr.vmem [resolvable:$true] %s27_s17 }
  0x10   :  { %s169_s18 = scalar_lea.vmem %s28_s17, 256  ;;  %p174_p6 = scmp.lt.s32.totalorder %s28_s17, %s28_s17 }
  0x11   :  { %p170_p5 = scmp.ne.s32.totalorder %s28_s17, %s169_s18  ;;  %p175_p7 = scmp.lt.s32.totalorder %s169_s18, %s169_s18 }
  0x13   :  { %p176_p8 = por %p175_p7, %p174_p6 }
  0x15   :  { %p177_p9 = pnand %p176_p8, %p170_p5 }
  0x17   :  { %180 = shalt.err (!%p177_p9)
}
  0x18   :  { %33 = dma.hbm_to_vmem [thread:$0]  %s271_s1, 256, %s28_s17, [#allocation6], %s208_s12, %s208_s12, %s209_s13  }
  0x19   :  { %201 = dma.done.wait [#allocation3], 256  }
  0x1a   :  { %202 = vsyncadd [#allocation3], 4294967040 }
  0x1b   :  { %203 = dma.done.wait [#allocation6], 256  }
  0x1c   :  { %204 = vsyncadd [#allocation6], 4294967040  ;;  %v40_v0 = vlaneseq  ;;  %v95_v6 = vld [vmem:[#allocation5 + $0x8] sm:$0xff]  ;;  %v62_v7 = vld [vmem:[#allocation5] sm:$0xff]  ;;  %s211_s0 = smov 3   ;;  %s212_s1 = smov [#allocation7]  }
  0x1d   :  { %v51_v8 = vld [vmem:[#allocation2] sm:$0xff]  ;;  %99 = vrot.lane.b32.xlu1 %v95_v6, %s211_s0  ;;  %v97_v9 = vcombine.high %v95_v6, %v95_v6  ;;  %66 = vrot.lane.b32.xlu0 %v62_v7, %s211_s0  ;;  %v64_v10 = vcombine.high %v62_v7, %v62_v7  ;;  %v82_v13 = vld [vmem:[#allocation2 + $0x8] sm:$0xff]  ;;  %s118_s21 = sshll.u32 %s212_s1, 4  ;;  %s119_s21 = int_to_ptr.vmem [resolvable:$true] %s118_s21 }
  0x1e   :  { %v41_v1 = vand.u32 127, %v40_v0  ;;  %v53_v12 = vcombine.high %v51_v8, %v51_v8  ;;  %v84_v15 = vcombine.high %v82_v13, %v82_v13  ;;  %s181_s22 = scalar_lea.vmem %s119_s21, 512  ;;  %p186_p11 = scmp.lt.s32.totalorder %s119_s21, %s119_s21 }
  0x1f   :  { %p182_p10 = scmp.ne.s32.totalorder %s119_s21, %s181_s22  ;;  %p187_p12 = scmp.lt.s32.totalorder %s181_s22, %s181_s22 }
  0x20   :  { %v42_v2 = vadd.s32 128, %v41_v1  ;;  %v43_v3 = vand.u32 15, %v41_v1  ;;  %vm70_vm2 = vcmp.lt.s32.totalorder %v41_v1, 3 }
  0x21   :  { %101 = vrot.lane.b32.xlu1 %v97_v9, %s211_s0  ;;  %68 = vrot.lane.b32.xlu0 %v64_v10, %s211_s0  ;;  %p188_p13 = por %p187_p12, %p186_p11 }
  0x22   :  { %v44_v4 = vand.u32 15, %v42_v2  ;;  %vm240_vm0 = vcmp.ge.s32.totalorder %v43_v3, 3 }
  0x23   :  { %v55_v14 = vsel %vm240_vm0, %v51_v8, 0.0  ;;  %v86_v16 = vsel %vm240_vm0, %v82_v13, 0.0  ;;  %p189_p0 = pnand %p188_p13, %p182_p10 }
  0x24   :  { %vm244_vm1 = vcmp.ge.s32.totalorder %v44_v4, 3 }
  0x25   :  { %v56_v17 = vsel %vm244_vm1, %v53_v12, 0.0  ;;  %v87_v18 = vsel %vm244_vm1, %v84_v15, 0.0 }
  0x26   :  { %v59_v19 = vcombine.low %v55_v14, %v56_v17  ;;  %v90_v20 = vcombine.low %v86_v16, %v87_v18 }
  0x28   :  { %61 = vst [vmem:[#allocation7] sm:$0xff] %v59_v19  ;;  %93 = vst [vmem:[#allocation7 + $0x10] sm:$0xff] %v90_v20 }
  0x8f   :  { %v100_v21 = vpop.permute.xlu1 %99  ;;  %v67_v22 = vpop.permute.xlu0 %66 }
  0x93   :  { %v102_v23 = vpop.permute.xlu1 %101  ;;  %v69_v24 = vpop.permute.xlu0 %68 }
  0x94   :  { %v103_v25 = vsel %vm70_vm2, %v100_v21, %v102_v23  ;;  %v104_v26 = vsel %vm70_vm2, %v102_v23, %v100_v21  ;;  %v71_v27 = vsel %vm70_vm2, %v67_v22, %v69_v24  ;;  %v72_v28 = vsel %vm70_vm2, %v69_v24, %v67_v22 }
  0x95   :  { %v105_v29 = vsel %vm240_vm0, %v104_v26, 0.0  ;;  %v106_v30 = vsel %vm244_vm1, %v103_v25, 0.0  ;;  %v73_v31 = vsel %vm240_vm0, %v72_v28, 0.0  ;;  %v74_v32 = vsel %vm244_vm1, %v71_v27, 0.0 }
  0x96   :  { %v109_v33 = vcombine.low %v105_v29, %v106_v30  ;;  %v77_v34 = vcombine.low %v73_v31, %v74_v32 }
  0x98   :  { %112 = vst [vmem:[#allocation7 + $0x18] sm:$0xff] %v109_v33  ;;  %80 = vst [vmem:[#allocation7 + $0x8] sm:$0xff] %v77_v34 }
  0x99   :  { %192 = shalt.err (!%p189_p0)
}
  0x9a   :  { %124 = dma.vmem_to_hbm [thread:$0]  %s119_s21, 512, %s272_s2, [#allocation4], %s208_s12, %s208_s12, %s209_s13  }
  0x9b   :  { %205 = dma.done.wait [#allocation4], 512  }
  0x9c   :  { %206 = vsyncadd [#allocation4], 4294966784 }
  0x9d   :  { %128 = vsyncpa [#allocation3], 1 }
  0x9e   :  { %129 = vsyncpa [#allocation6], 1 }
  0x9f   :  { %130 = vsyncpa [#allocation4], 1 }

</bundles_post_ra>
